<compile_context>
chip_gen: v7x
topology: tpu7x:2x2x1
jax: 0.10.0
libtpu: 0.0.40
codegen_flags: <defaults>
</compile_context>

<pallas_src>
import functools

import jax
import jax.numpy as jnp
from jax import lax
from jax.experimental import pallas as pl
from jax.experimental.pallas import tpu as pltpu

# Small config (scaled down from nz=100, ngf=64, nc=1 of the original opt)
NZ = 16      # latent dim
NGF = 8      # generator feature maps
NC = 1       # output channels
BATCH = 2
EPS = 1e-5


# ---------------------------------------------------------------------------
# Fused Pallas kernel: out[g] = act(a[g] @ b[g] + shift)
#   a: (G, Ma, K) bf16, b: (G, K, Nb) bf16, shift: (Ma,1) or (1,Nb) f32
# ---------------------------------------------------------------------------
def _fused_bmm_shift_act_kernel(a_ref, b_ref, shift_ref, o_ref, *, act):
    y = jnp.dot(a_ref[0, :, :], b_ref[0, :, :],
                preferred_element_type=jnp.float32)
    y = y + shift_ref[...]
    if act == "relu":
        y = jnp.maximum(y, 0.0)
    elif act == "tanh":
        y = jnp.tanh(y)
    o_ref[0, :, :] = y.astype(o_ref.dtype)


def fused_bmm_shift_act(a, b, shift2, act):
    """a: (G, Ma, K), b: (G, K, Nb), shift2: (Ma,1) or (1,Nb) -> (G, Ma, Nb) f32."""
    G, Ma, K = a.shape
    Gb, Kb, Nb = b.shape
    assert G == Gb and K == Kb, (a.shape, b.shape)
    a16 = a.astype(jnp.bfloat16)
    b16 = b.astype(jnp.bfloat16)
    shift2 = shift2.astype(jnp.float32)

    return pl.pallas_call(
        functools.partial(_fused_bmm_shift_act_kernel, act=act),
        out_shape=jax.ShapeDtypeStruct((G, Ma, Nb), jnp.float32),
        grid_spec=pltpu.PrefetchScalarGridSpec(
            num_scalar_prefetch=0,
            grid=(G,),
            in_specs=[
                pl.BlockSpec((1, Ma, K), lambda g: (g, 0, 0)),   # weights (per phase)
                pl.BlockSpec((1, K, Nb), lambda g: (g, 0, 0)),   # patches (per phase)
                pl.BlockSpec(shift2.shape, lambda g: (0, 0)),    # BN shift
            ],
            out_specs=pl.BlockSpec((1, Ma, Nb), lambda g: (g, 0, 0)),
        ),
        compiler_params=pltpu.CompilerParams(
            dimension_semantics=("parallel",)),
    )(a16, b16, shift2)


# ---------------------------------------------------------------------------
# Layer 1: ConvTranspose2d(k=4, s=1, p=0) on a 1x1 input == outer product.
# ---------------------------------------------------------------------------
def first_layer(x_nchw, w, scale, shift, act):
    """x_nchw: (N, Cin, 1, 1); w: (Cin, Cout, 4, 4) -> channel-major (Cout, N, 4, 4)."""
    N = x_nchw.shape[0]
    Cin, Cout, k, _ = w.shape
    x2 = x_nchw.reshape(N, Cin)
    wmat = (w * scale[None, :, None, None]).reshape(Cin, Cout * k * k)
    shift2 = jnp.repeat(shift, k * k).reshape(1, Cout * k * k)
    out = fused_bmm_shift_act(x2[None], wmat[None], shift2, act)  # (1, N, Cout*k*k)
    out = out.reshape(N, Cout, k, k)
    return jnp.transpose(out, (1, 0, 2, 3))                       # (Cout, N, 4, 4)


# ---------------------------------------------------------------------------
# Stride-2 layer: ConvTranspose2d(k=4, s=2, p=1, bias=False) + folded BN + act,
# via sub-pixel decomposition (4 independent 2x2 convs, one per output phase).
# ---------------------------------------------------------------------------
def conv_transpose_s2_layer(x_cm, w, scale, shift, act):
    """x_cm: (Cin, N, H, W) channel-major; w: (Cin, Cout, 4, 4) -> (Cout, N, 2H, 2W)."""
    Cin, N, H, W = x_cm.shape
    _, Cout, k, _ = w.shape
    assert k == 4
    ws = w * scale[None, :, None, None]              # fold BN scale into weights
    xp = jnp.pad(x_cm, ((0, 0), (0, 0), (1, 1), (1, 1)))

    # For output phase p in {0,1} along one spatial axis and tap d in {0,1}:
    #   padded-input start offset = p + d
    #   kernel index            = 3 - 2d  (p == 0)   /   2 - 2d  (p == 1)
    def taps(p):
        return [(p + d, 3 - 2 * d if p == 0 else 2 - 2 * d) for d in (0, 1)]

    a_list, b_list = [], []
    for py in (0, 1):
        for px in (0, 1):
            slices, wrows = [], []
            for oy, ky in taps(py):
                for ox, kx in taps(px):
                    slices.append(xp[:, :, oy:oy + H, ox:ox + W])   # (Cin, N, H, W)
                    wrows.append(ws[:, :, ky, kx])                  # (Cin, Cout)
            patches = jnp.stack(slices, axis=0).reshape(4 * Cin, N * H * W)
            wT = jnp.transpose(jnp.stack(wrows, axis=0), (2, 0, 1))  # (Cout, 4, Cin)
            a_list.append(wT.reshape(Cout, 4 * Cin))
            b_list.append(patches)

    a = jnp.stack(a_list, axis=0)                    # (4, Cout, 4*Cin)
    b = jnp.stack(b_list, axis=0)                    # (4, 4*Cin, N*H*W)
    out = fused_bmm_shift_act(a, b, shift.reshape(Cout, 1), act)   # (4, Cout, N*H*W)

    # Interleave the 4 phases: out[ph=py*2+px][co,n,m,q] -> res[co,n,2m+py,2q+px]
    out = out.reshape(2, 2, Cout, N, H, W)           # (py, px, Cout, N, H, W)
    out = jnp.transpose(out, (2, 3, 4, 0, 5, 1))     # (Cout, N, H, py, W, px)
    return out.reshape(Cout, N, 2 * H, 2 * W)


# ---------------------------------------------------------------------------
# Generator: parameter init + forward
# ---------------------------------------------------------------------------
LAYER_SPECS = [
    # (cin,      cout,    k, s, p, has_bn, act)
    (NZ,       NGF * 8, 4, 1, 0, True,  "relu"),
    (NGF * 8,  NGF * 4, 4, 2, 1, True,  "relu"),
    (NGF * 4,  NGF * 2, 4, 2, 1, True,  "relu"),
    (NGF * 2,  NGF,     4, 2, 1, True,  "relu"),
    (NGF,      NC,      4, 2, 1, False, "tanh"),
]


def init_params(key):
    params = []
    for (cin, cout, k, s, p, has_bn, act) in LAYER_SPECS:
        key, kw, kg, kb, km, kv = jax.random.split(key, 6)
        w = 0.05 * jax.random.normal(kw, (cin, cout, k, k), jnp.float32)
        if has_bn:
            gamma = 1.0 + 0.1 * jax.random.normal(kg, (cout,), jnp.float32)
            beta = 0.1 * jax.random.normal(kb, (cout,), jnp.float32)
            mean = 0.1 * jax.random.normal(km, (cout,), jnp.float32)
            var = 1.0 + 0.1 * jax.random.uniform(kv, (cout,), jnp.float32)
            scale = gamma / jnp.sqrt(var + EPS)
            shift = beta - mean * scale
        else:
            scale = jnp.ones((cout,), jnp.float32)
            shift = jnp.zeros((cout,), jnp.float32)
        params.append(dict(w=w, scale=scale, shift=shift,
                           stride=s, pad=p, has_bn=has_bn, act=act))
    return params


def generator_forward(x_nchw, params):
    """x_nchw: (N, NZ, 1, 1) float32 -> (N, NC, 64, 64) float32."""
    p0 = params[0]
    x = first_layer(x_nchw, p0["w"], p0["scale"], p0["shift"], p0["act"])
    for p in params[1:]:
        assert p["stride"] == 2 and p["pad"] == 1
        x = conv_transpose_s2_layer(x, p["w"], p["scale"], p["shift"], p["act"])
    return jnp.transpose(x, (1, 0, 2, 3))            # channel-major -> NCHW


# ---------------------------------------------------------------------------
# Pure-JAX reference (lax.conv_general_dilated) for correctness checking
# ---------------------------------------------------------------------------
def reference_forward(x_nchw, params):
    x = x_nchw
    for p in params:
        w = p["w"]                                          # (Cin, Cout, k, k)
        k = w.shape[2]
        wf = jnp.transpose(w[:, :, ::-1, ::-1], (1, 0, 2, 3))  # OIHW, flipped
        pe = k - 1 - p["pad"]
        x = lax.conv_general_dilated(
            x, wf, window_strides=(1, 1),
            padding=[(pe, pe), (pe, pe)],
            lhs_dilation=(p["stride"], p["stride"]),
            dimension_numbers=("NCHW", "OIHW", "NCHW"),
            precision=lax.Precision.HIGHEST)
        x = x * p["scale"][None, :, None, None] + p["shift"][None, :, None, None]
        if p["act"] == "relu":
            x = jnp.maximum(x, 0.0)
        else:
            x = jnp.tanh(x)
    return x


if __name__ == "__main__":
    key = jax.random.PRNGKey(0)
    k_params, k_input = jax.random.split(key)
    params = init_params(k_params)

    # latent input, PyTorch NCHW convention: (batch, nz, 1, 1)
    x = jax.random.normal(k_input, (BATCH, NZ, 1, 1), jnp.float32)

    gen_fn = jax.jit(lambda xx: generator_forward(xx, params))
    out = jax.block_until_ready(gen_fn(x))
    assert out.shape == (BATCH, NC, 64, 64), out.shape

    ref = jax.block_until_ready(reference_forward(x, params))
    # bf16 matmul inputs (f32 accumulation) vs f32 HIGHEST reference
    assert jnp.allclose(out, ref, atol=1e-2, rtol=1e-2), (
        float(jnp.max(jnp.abs(out - ref))))

    print("KERNEL_OK")
</pallas_src>

<mosaic_0001>
module attributes {stable_mosaic.version = 11 : i64} {
  func.func @_fused_bmm_shift_act_kernel(%arg0: i32, %arg1: memref<1x2x16xbf16, #tpu.memory_space<vmem>>, %arg2: memref<1x16x1024xbf16, #tpu.memory_space<vmem>>, %arg3: memref<1x1024xf32, #tpu.memory_space<vmem>>, %arg4: memref<1x2x1024xf32, #tpu.memory_space<vmem>>) attributes {dimension_semantics = [#tpu.dimension_semantics<parallel>], iteration_bounds = array<i64: 1>, scalar_prefetch = 0 : i64, scratch_operands = 0 : i64, tpu.core_type = #tpu.core_type<tc>, window_params = [{transform_indices = @transform_0, window_bounds = array<i64: 1, 2, 16>}, {transform_indices = @transform_1, window_bounds = array<i64: 1, 16, 1024>}, {pipeline_mode = #tpu.pipeline_mode<synchronous>, transform_indices = @transform_2, window_bounds = array<i64: 1, 1024>}, {transform_indices = @transform_3, window_bounds = array<i64: 1, 2, 1024>}]} {
    %c0 = arith.constant 0 : index
    %c0_0 = arith.constant 0 : index
    %c0_1 = arith.constant 0 : index
    %0 = vector.load %arg1[%c0, %c0_0, %c0_1] : memref<1x2x16xbf16, #tpu.memory_space<vmem>>, vector<1x2x16xbf16>
    %1 = vector.shape_cast %0 : vector<1x2x16xbf16> to vector<2x16xbf16>
    %c0_2 = arith.constant 0 : index
    %c0_3 = arith.constant 0 : index
    %c0_4 = arith.constant 0 : index
    %2 = vector.load %arg2[%c0_2, %c0_3, %c0_4] : memref<1x16x1024xbf16, #tpu.memory_space<vmem>>, vector<1x16x1024xbf16>
    %3 = vector.shape_cast %2 : vector<1x16x1024xbf16> to vector<16x1024xbf16>
    %cst = arith.constant dense<0.000000e+00> : vector<2x1024xf32>
    %4 = tpu.matmul %1, %3, %cst {dimension_numbers = #tpu.dot_dimension_numbers<[1], [0], [0], [1], [0, 0, 1, 1], [], []>} : vector<2x16xbf16>, vector<16x1024xbf16>, vector<2x1024xf32> -> vector<2x1024xf32>
    %c0_5 = arith.constant 0 : index
    %c0_6 = arith.constant 0 : index
    %5 = vector.load %arg3[%c0_5, %c0_6] : memref<1x1024xf32, #tpu.memory_space<vmem>>, vector<1x1024xf32>
    %6 = vector.broadcast %5 : vector<1x1024xf32> to vector<2x1024xf32>
    %7 = arith.addf %4, %6 : vector<2x1024xf32>
    %cst_7 = arith.constant 0.000000e+00 : f32
    %8 = vector.broadcast %cst_7 : f32 to vector<2x1024xf32>
    %9 = arith.maximumf %7, %8 : vector<2x1024xf32>
    %c0_8 = arith.constant 0 : index
    %c0_9 = arith.constant 0 : index
    %c0_10 = arith.constant 0 : index
    %10 = vector.load %arg4[%c0_8, %c0_9, %c0_10] : memref<1x2x1024xf32, #tpu.memory_space<vmem>>, vector<1x2x1024xf32>
    %11 = vector.shape_cast %10 : vector<1x2x1024xf32> to vector<2x1024xf32>
    %12 = vector.shape_cast %9 : vector<2x1024xf32> to vector<1x2x1024xf32>
    tpu.vector_store %arg4[%c0_8, %c0_9, %c0_10], %12 {strides = array<i32>} : memref<1x2x1024xf32, #tpu.memory_space<vmem>>, vector<1x2x1024xf32>,
    return
  }
  func.func @transform_0(%arg0: i32) -> (i32, i32, i32) {
    %c0_i32 = arith.constant 0 : i32
    %c0_i32_0 = arith.constant 0 : i32
    %c0_i32_1 = arith.constant 0 : i32
    return %arg0, %c0_i32, %c0_i32_0 : i32, i32, i32
  }
  func.func @transform_1(%arg0: i32) -> (i32, i32, i32) {
    %c0_i32 = arith.constant 0 : i32
    %c0_i32_0 = arith.constant 0 : i32
    %c0_i32_1 = arith.constant 0 : i32
    return %arg0, %c0_i32, %c0_i32_0 : i32, i32, i32
  }
  func.func @transform_2(%arg0: i32) -> (i32, i32) {
    %c0_i32 = arith.constant 0 : i32
    %c0_i32_0 = arith.constant 0 : i32
    %c0_i32_1 = arith.constant 0 : i32
    return %c0_i32, %c0_i32_0 : i32, i32
  }
  func.func @transform_3(%arg0: i32) -> (i32, i32, i32) {
    %c0_i32 = arith.constant 0 : i32
    %c0_i32_0 = arith.constant 0 : i32
    %c0_i32_1 = arith.constant 0 : i32
    return %arg0, %c0_i32, %c0_i32_0 : i32, i32, i32
  }
}

module attributes {stable_mosaic.version = 11 : i64} {
  func.func @_fused_bmm_shift_act_kernel(%arg0: i32, %arg1: memref<1x32x256xbf16, #tpu.memory_space<vmem>>, %arg2: memref<1x256x32xbf16, #tpu.memory_space<vmem>>, %arg3: memref<32x1xf32, #tpu.memory_space<vmem>>, %arg4: memref<1x32x32xf32, #tpu.memory_space<vmem>>) attributes {dimension_semantics = [#tpu.dimension_semantics<parallel>], iteration_bounds = array<i64: 4>, scalar_prefetch = 0 : i64, scratch_operands = 0 : i64, tpu.core_type = #tpu.core_type<tc>, window_params = [{transform_indices = @transform_0, window_bounds = array<i64: 1, 32, 256>}, {transform_indices = @transform_1, window_bounds = array<i64: 1, 256, 32>}, {pipeline_mode = #tpu.pipeline_mode<synchronous>, transform_indices = @transform_2, window_bounds = array<i64: 32, 1>}, {transform_indices = @transform_3, window_bounds = array<i64: 1, 32, 32>}]} {
    %c0 = arith.constant 0 : index
    %c0_0 = arith.constant 0 : index
    %c0_1 = arith.constant 0 : index
    %0 = vector.load %arg1[%c0, %c0_0, %c0_1] : memref<1x32x256xbf16, #tpu.memory_space<vmem>>, vector<1x32x256xbf16>
    %1 = vector.shape_cast %0 : vector<1x32x256xbf16> to vector<32x256xbf16>
    %c0_2 = arith.constant 0 : index
    %c0_3 = arith.constant 0 : index
    %c0_4 = arith.constant 0 : index
    %2 = vector.load %arg2[%c0_2, %c0_3, %c0_4] : memref<1x256x32xbf16, #tpu.memory_space<vmem>>, vector<1x256x32xbf16>
    %3 = vector.shape_cast %2 : vector<1x256x32xbf16> to vector<256x32xbf16>
    %cst = arith.constant dense<0.000000e+00> : vector<32x32xf32>
    %4 = tpu.matmul %1, %3, %cst {dimension_numbers = #tpu.dot_dimension_numbers<[1], [0], [0], [1], [0, 0, 1, 1], [], []>} : vector<32x256xbf16>, vector<256x32xbf16>, vector<32x32xf32> -> vector<32x32xf32>
    %c0_5 = arith.constant 0 : index
    %c0_6 = arith.constant 0 : index
    %5 = vector.load %arg3[%c0_5, %c0_6] : memref<32x1xf32, #tpu.memory_space<vmem>>, vector<32x1xf32>
    %6 = vector.broadcast %5 : vector<32x1xf32> to vector<32x32xf32>
    %7 = arith.addf %4, %6 : vector<32x32xf32>
    %cst_7 = arith.constant 0.000000e+00 : f32
    %8 = vector.broadcast %cst_7 : f32 to vector<32x32xf32>
    %9 = arith.maximumf %7, %8 : vector<32x32xf32>
    %c0_8 = arith.constant 0 : index
    %c0_9 = arith.constant 0 : index
    %c0_10 = arith.constant 0 : index
    %10 = vector.load %arg4[%c0_8, %c0_9, %c0_10] : memref<1x32x32xf32, #tpu.memory_space<vmem>>, vector<1x32x32xf32>
    %11 = vector.shape_cast %10 : vector<1x32x32xf32> to vector<32x32xf32>
    %12 = vector.shape_cast %9 : vector<32x32xf32> to vector<1x32x32xf32>
    tpu.vector_store %arg4[%c0_8, %c0_9, %c0_10], %12 {strides = array<i32>} : memref<1x32x32xf32, #tpu.memory_space<vmem>>, vector<1x32x32xf32>,
    return
  }
  func.func @transform_0(%arg0: i32) -> (i32, i32, i32) {
    %c0_i32 = arith.constant 0 : i32
    %c0_i32_0 = arith.constant 0 : i32
    %c0_i32_1 = arith.constant 0 : i32
    return %arg0, %c0_i32, %c0_i32_0 : i32, i32, i32
  }
  func.func @transform_1(%arg0: i32) -> (i32, i32, i32) {
    %c0_i32 = arith.constant 0 : i32
    %c0_i32_0 = arith.constant 0 : i32
    %c0_i32_1 = arith.constant 0 : i32
    return %arg0, %c0_i32, %c0_i32_0 : i32, i32, i32
  }
  func.func @transform_2(%arg0: i32) -> (i32, i32) {
    %c0_i32 = arith.constant 0 : i32
    %c0_i32_0 = arith.constant 0 : i32
    %c0_i32_1 = arith.constant 0 : i32
    return %c0_i32, %c0_i32_0 : i32, i32
  }
  func.func @transform_3(%arg0: i32) -> (i32, i32, i32) {
    %c0_i32 = arith.constant 0 : i32
    %c0_i32_0 = arith.constant 0 : i32
    %c0_i32_1 = arith.constant 0 : i32
    return %arg0, %c0_i32, %c0_i32_0 : i32, i32, i32
  }
}

module attributes {stable_mosaic.version = 11 : i64} {
  func.func @_fused_bmm_shift_act_kernel(%arg0: i32, %arg1: memref<1x16x128xbf16, #tpu.memory_space<vmem>>, %arg2: memref<1x128x128xbf16, #tpu.memory_space<vmem>>, %arg3: memref<16x1xf32, #tpu.memory_space<vmem>>, %arg4: memref<1x16x128xf32, #tpu.memory_space<vmem>>) attributes {dimension_semantics = [#tpu.dimension_semantics<parallel>], iteration_bounds = array<i64: 4>, scalar_prefetch = 0 : i64, scratch_operands = 0 : i64, tpu.core_type = #tpu.core_type<tc>, window_params = [{transform_indices = @transform_0, window_bounds = array<i64: 1, 16, 128>}, {transform_indices = @transform_1, window_bounds = array<i64: 1, 128, 128>}, {pipeline_mode = #tpu.pipeline_mode<synchronous>, transform_indices = @transform_2, window_bounds = array<i64: 16, 1>}, {transform_indices = @transform_3, window_bounds = array<i64: 1, 16, 128>}]} {
    %c0 = arith.constant 0 : index
    %c0_0 = arith.constant 0 : index
    %c0_1 = arith.constant 0 : index
    %0 = vector.load %arg1[%c0, %c0_0, %c0_1] : memref<1x16x128xbf16, #tpu.memory_space<vmem>>, vector<1x16x128xbf16>
    %1 = vector.shape_cast %0 : vector<1x16x128xbf16> to vector<16x128xbf16>
    %c0_2 = arith.constant 0 : index
    %c0_3 = arith.constant 0 : index
    %c0_4 = arith.constant 0 : index
    %2 = vector.load %arg2[%c0_2, %c0_3, %c0_4] : memref<1x128x128xbf16, #tpu.memory_space<vmem>>, vector<1x128x128xbf16>
    %3 = vector.shape_cast %2 : vector<1x128x128xbf16> to vector<128x128xbf16>
    %cst = arith.constant dense<0.000000e+00> : vector<16x128xf32>
    %4 = tpu.matmul %1, %3, %cst {dimension_numbers = #tpu.dot_dimension_numbers<[1], [0], [0], [1], [0, 0, 1, 1], [], []>} : vector<16x128xbf16>, vector<128x128xbf16>, vector<16x128xf32> -> vector<16x128xf32>
    %c0_5 = arith.constant 0 : index
    %c0_6 = arith.constant 0 : index
    %5 = vector.load %arg3[%c0_5, %c0_6] : memref<16x1xf32, #tpu.memory_space<vmem>>, vector<16x1xf32>
    %6 = vector.broadcast %5 : vector<16x1xf32> to vector<16x128xf32>
    %7 = arith.addf %4, %6 : vector<16x128xf32>
    %cst_7 = arith.constant 0.000000e+00 : f32
    %8 = vector.broadcast %cst_7 : f32 to vector<16x128xf32>
    %9 = arith.maximumf %7, %8 : vector<16x128xf32>
    %c0_8 = arith.constant 0 : index
    %c0_9 = arith.constant 0 : index
    %c0_10 = arith.constant 0 : index
    %10 = vector.load %arg4[%c0_8, %c0_9, %c0_10] : memref<1x16x128xf32, #tpu.memory_space<vmem>>, vector<1x16x128xf32>
    %11 = vector.shape_cast %10 : vector<1x16x128xf32> to vector<16x128xf32>
    %12 = vector.shape_cast %9 : vector<16x128xf32> to vector<1x16x128xf32>
    tpu.vector_store %arg4[%c0_8, %c0_9, %c0_10], %12 {strides = array<i32>} : memref<1x16x128xf32, #tpu.memory_space<vmem>>, vector<1x16x128xf32>,
    return
  }
  func.func @transform_0(%arg0: i32) -> (i32, i32, i32) {
    %c0_i32 = arith.constant 0 : i32
    %c0_i32_0 = arith.constant 0 : i32
    %c0_i32_1 = arith.constant 0 : i32
    return %arg0, %c0_i32, %c0_i32_0 : i32, i32, i32
  }
  func.func @transform_1(%arg0: i32) -> (i32, i32, i32) {
    %c0_i32 = arith.constant 0 : i32
    %c0_i32_0 = arith.constant 0 : i32
    %c0_i32_1 = arith.constant 0 : i32
    return %arg0, %c0_i32, %c0_i32_0 : i32, i32, i32
  }
  func.func @transform_2(%arg0: i32) -> (i32, i32) {
    %c0_i32 = arith.constant 0 : i32
    %c0_i32_0 = arith.constant 0 : i32
    %c0_i32_1 = arith.constant 0 : i32
    return %c0_i32, %c0_i32_0 : i32, i32
  }
  func.func @transform_3(%arg0: i32) -> (i32, i32, i32) {
    %c0_i32 = arith.constant 0 : i32
    %c0_i32_0 = arith.constant 0 : i32
    %c0_i32_1 = arith.constant 0 : i32
    return %arg0, %c0_i32, %c0_i32_0 : i32, i32, i32
  }
}

module attributes {stable_mosaic.version = 11 : i64} {
  func.func @_fused_bmm_shift_act_kernel(%arg0: i32, %arg1: memref<1x8x64xbf16, #tpu.memory_space<vmem>>, %arg2: memref<1x64x512xbf16, #tpu.memory_space<vmem>>, %arg3: memref<8x1xf32, #tpu.memory_space<vmem>>, %arg4: memref<1x8x512xf32, #tpu.memory_space<vmem>>) attributes {dimension_semantics = [#tpu.dimension_semantics<parallel>], iteration_bounds = array<i64: 4>, scalar_prefetch = 0 : i64, scratch_operands = 0 : i64, tpu.core_type = #tpu.core_type<tc>, window_params = [{transform_indices = @transform_0, window_bounds = array<i64: 1, 8, 64>}, {transform_indices = @transform_1, window_bounds = array<i64: 1, 64, 512>}, {pipeline_mode = #tpu.pipeline_mode<synchronous>, transform_indices = @transform_2, window_bounds = array<i64: 8, 1>}, {transform_indices = @transform_3, window_bounds = array<i64: 1, 8, 512>}]} {
    %c0 = arith.constant 0 : index
    %c0_0 = arith.constant 0 : index
    %c0_1 = arith.constant 0 : index
    %0 = vector.load %arg1[%c0, %c0_0, %c0_1] : memref<1x8x64xbf16, #tpu.memory_space<vmem>>, vector<1x8x64xbf16>
    %1 = vector.shape_cast %0 : vector<1x8x64xbf16> to vector<8x64xbf16>
    %c0_2 = arith.constant 0 : index
    %c0_3 = arith.constant 0 : index
    %c0_4 = arith.constant 0 : index
    %2 = vector.load %arg2[%c0_2, %c0_3, %c0_4] : memref<1x64x512xbf16, #tpu.memory_space<vmem>>, vector<1x64x512xbf16>
    %3 = vector.shape_cast %2 : vector<1x64x512xbf16> to vector<64x512xbf16>
    %cst = arith.constant dense<0.000000e+00> : vector<8x512xf32>
    %4 = tpu.matmul %1, %3, %cst {dimension_numbers = #tpu.dot_dimension_numbers<[1], [0], [0], [1], [0, 0, 1, 1], [], []>} : vector<8x64xbf16>, vector<64x512xbf16>, vector<8x512xf32> -> vector<8x512xf32>
    %c0_5 = arith.constant 0 : index
    %c0_6 = arith.constant 0 : index
    %5 = vector.load %arg3[%c0_5, %c0_6] : memref<8x1xf32, #tpu.memory_space<vmem>>, vector<8x1xf32>
    %6 = vector.broadcast %5 : vector<8x1xf32> to vector<8x512xf32>
    %7 = arith.addf %4, %6 : vector<8x512xf32>
    %cst_7 = arith.constant 0.000000e+00 : f32
    %8 = vector.broadcast %cst_7 : f32 to vector<8x512xf32>
    %9 = arith.maximumf %7, %8 : vector<8x512xf32>
    %c0_8 = arith.constant 0 : index
    %c0_9 = arith.constant 0 : index
    %c0_10 = arith.constant 0 : index
    %10 = vector.load %arg4[%c0_8, %c0_9, %c0_10] : memref<1x8x512xf32, #tpu.memory_space<vmem>>, vector<1x8x512xf32>
    %11 = vector.shape_cast %10 : vector<1x8x512xf32> to vector<8x512xf32>
    %12 = vector.shape_cast %9 : vector<8x512xf32> to vector<1x8x512xf32>
    tpu.vector_store %arg4[%c0_8, %c0_9, %c0_10], %12 {strides = array<i32>} : memref<1x8x512xf32, #tpu.memory_space<vmem>>, vector<1x8x512xf32>,
    return
  }
  func.func @transform_0(%arg0: i32) -> (i32, i32, i32) {
    %c0_i32 = arith.constant 0 : i32
    %c0_i32_0 = arith.constant 0 : i32
    %c0_i32_1 = arith.constant 0 : i32
    return %arg0, %c0_i32, %c0_i32_0 : i32, i32, i32
  }
  func.func @transform_1(%arg0: i32) -> (i32, i32, i32) {
    %c0_i32 = arith.constant 0 : i32
    %c0_i32_0 = arith.constant 0 : i32
    %c0_i32_1 = arith.constant 0 : i32
    return %arg0, %c0_i32, %c0_i32_0 : i32, i32, i32
  }
  func.func @transform_2(%arg0: i32) -> (i32, i32) {
    %c0_i32 = arith.constant 0 : i32
    %c0_i32_0 = arith.constant 0 : i32
    %c0_i32_1 = arith.constant 0 : i32
    return %c0_i32, %c0_i32_0 : i32, i32
  }
  func.func @transform_3(%arg0: i32) -> (i32, i32, i32) {
    %c0_i32 = arith.constant 0 : i32
    %c0_i32_0 = arith.constant 0 : i32
    %c0_i32_1 = arith.constant 0 : i32
    return %arg0, %c0_i32, %c0_i32_0 : i32, i32, i32
  }
}

module attributes {stable_mosaic.version = 11 : i64} {
  func.func @_fused_bmm_shift_act_kernel(%arg0: i32, %arg1: memref<1x1x32xbf16, #tpu.memory_space<vmem>>, %arg2: memref<1x32x2048xbf16, #tpu.memory_space<vmem>>, %arg3: memref<1x1xf32, #tpu.memory_space<vmem>>, %arg4: memref<1x1x2048xf32, #tpu.memory_space<vmem>>) attributes {dimension_semantics = [#tpu.dimension_semantics<parallel>], iteration_bounds = array<i64: 4>, scalar_prefetch = 0 : i64, scratch_operands = 0 : i64, tpu.core_type = #tpu.core_type<tc>, window_params = [{transform_indices = @transform_0, window_bounds = array<i64: 1, 1, 32>}, {transform_indices = @transform_1, window_bounds = array<i64: 1, 32, 2048>}, {pipeline_mode = #tpu.pipeline_mode<synchronous>, transform_indices = @transform_2, window_bounds = array<i64: 1, 1>}, {transform_indices = @transform_3, window_bounds = array<i64: 1, 1, 2048>}]} {
    %c0 = arith.constant 0 : index
    %c0_0 = arith.constant 0 : index
    %c0_1 = arith.constant 0 : index
    %0 = vector.load %arg1[%c0, %c0_0, %c0_1] : memref<1x1x32xbf16, #tpu.memory_space<vmem>>, vector<1x1x32xbf16>
    %1 = vector.shape_cast %0 : vector<1x1x32xbf16> to vector<1x32xbf16>
    %c0_2 = arith.constant 0 : index
    %c0_3 = arith.constant 0 : index
    %c0_4 = arith.constant 0 : index
    %2 = vector.load %arg2[%c0_2, %c0_3, %c0_4] : memref<1x32x2048xbf16, #tpu.memory_space<vmem>>, vector<1x32x2048xbf16>
    %3 = vector.shape_cast %2 : vector<1x32x2048xbf16> to vector<32x2048xbf16>
    %cst = arith.constant dense<0.000000e+00> : vector<1x2048xf32>
    %4 = tpu.matmul %1, %3, %cst {dimension_numbers = #tpu.dot_dimension_numbers<[1], [0], [0], [1], [0, 0, 1, 1], [], []>} : vector<1x32xbf16>, vector<32x2048xbf16>, vector<1x2048xf32> -> vector<1x2048xf32>
    %c0_5 = arith.constant 0 : index
    %c0_6 = arith.constant 0 : index
    %5 = vector.load %arg3[%c0_5, %c0_6] : memref<1x1xf32, #tpu.memory_space<vmem>>, vector<1x1xf32>
    %6 = vector.broadcast %5 : vector<1x1xf32> to vector<1x2048xf32>
    %7 = arith.addf %4, %6 : vector<1x2048xf32>
    %8 = math.tanh %7 : vector<1x2048xf32>
    %c0_7 = arith.constant 0 : index
    %c0_8 = arith.constant 0 : index
    %c0_9 = arith.constant 0 : index
    %9 = vector.load %arg4[%c0_7, %c0_8, %c0_9] : memref<1x1x2048xf32, #tpu.memory_space<vmem>>, vector<1x1x2048xf32>
    %10 = vector.shape_cast %9 : vector<1x1x2048xf32> to vector<1x2048xf32>
    %11 = vector.shape_cast %8 : vector<1x2048xf32> to vector<1x1x2048xf32>
    tpu.vector_store %arg4[%c0_7, %c0_8, %c0_9], %11 {strides = array<i32>} : memref<1x1x2048xf32, #tpu.memory_space<vmem>>, vector<1x1x2048xf32>,
    return
  }
  func.func @transform_0(%arg0: i32) -> (i32, i32, i32) {
    %c0_i32 = arith.constant 0 : i32
    %c0_i32_0 = arith.constant 0 : i32
    %c0_i32_1 = arith.constant 0 : i32
    return %arg0, %c0_i32, %c0_i32_0 : i32, i32, i32
  }
  func.func @transform_1(%arg0: i32) -> (i32, i32, i32) {
    %c0_i32 = arith.constant 0 : i32
    %c0_i32_0 = arith.constant 0 : i32
    %c0_i32_1 = arith.constant 0 : i32
    return %arg0, %c0_i32, %c0_i32_0 : i32, i32, i32
  }
  func.func @transform_2(%arg0: i32) -> (i32, i32) {
    %c0_i32 = arith.constant 0 : i32
    %c0_i32_0 = arith.constant 0 : i32
    %c0_i32_1 = arith.constant 0 : i32
    return %c0_i32, %c0_i32_0 : i32, i32
  }
  func.func @transform_3(%arg0: i32) -> (i32, i32, i32) {
    %c0_i32 = arith.constant 0 : i32
    %c0_i32_0 = arith.constant 0 : i32
    %c0_i32_1 = arith.constant 0 : i32
    return %arg0, %c0_i32, %c0_i32_0 : i32, i32, i32
  }
}

</mosaic_0001>

<bundles_post_ra>
// kernel: _lambda_.5
= control target key start
LH: loop header
LB: loop body
LE: loop exit
PB: predicated region body
PF: predicated region fallthrough
CT: control target
= control target key end

     0   :  { %v346_v3 = vmov 0   ;;  %vm106_vm0 = vcmask 130048   ;;  %v26_v18 = vlaneseq  ;;  %v347_v25 = vmov 1983009808   ;;  %s404_s1 = inlined_call_operand.vmem [shape: bf16[1,16,1024], index: 1, kind: input, shape index: {}]   ;;  %s405_s0 = inlined_call_operand.vmem [shape: bf16[1,2,16], index: 0, kind: input, shape index: {}]   ;;  %s406_s2 = inlined_call_operand.vmem [shape: f32[1,1024], index: 2, kind: input, shape index: {}]   ;;  %s407_s3 = inlined_call_operand.vmem [shape: f32[1,2,1024], index: 3, kind: output, shape index: {}]  }
   0x1   :  { %v16_v0 = vld [vmem:[%s404_s1] sm:$0xff]  ;;  %v17_v2 = vld [vmem:[%s404_s1 + $0x8] sm:$0xff]  ;;  %142 = vmatprep.mubr.bf16.mxu0 %v346_v3  ;;  %183 = vmatprep.mubr.bf16.mxu1 %v346_v3  ;;  %v18_v7 = vld [vmem:[%s404_s1 + $0x10] sm:$0xff]  ;;  %v293_v26 = vunpack.c.l.s4 %v347_v25 }
   0x2   :  { %v20_v1 = vld [vmem:[%s404_s1 + $0x20] sm:$0xff]  ;;  %v21_v5 = vld [vmem:[%s404_s1 + $0x28] sm:$0xff]  ;;  %v22_v10 = vld [vmem:[%s404_s1 + $0x30] sm:$0xff]  ;;  %v27_v19 = vshrl.u32 %v26_v18, 7 }
   0x3   :  { %v333_v4 = vcombine.high %v16_v0, %v20_v1  ;;  %v332_v6 = vcombine.low %v16_v0, %v20_v1  ;;  %v335_v8 = vcombine.high %v17_v2, %v21_v5  ;;  %v334_v9 = vcombine.low %v17_v2, %v21_v5  ;;  %v19_v11 = vld [vmem:[%s404_s1 + $0x18] sm:$0xff]  ;;  %v15_v15 = vld [vmem:[%s405_s0] sm:$0x1] }
   0x4   :  { %v23_v12 = vld [vmem:[%s404_s1 + $0x38] sm:$0xff]  ;;  %v337_v13 = vcombine.high %v18_v7, %v22_v10  ;;  %v336_v16 = vcombine.low %v18_v7, %v22_v10  ;;  %v28_v20 = vsub.s32 0, %v27_v19  ;;  %v24_v21 = vld [vmem:[%s406_s2] sm:$0xff]  ;;  %v36_v22 = vsub.s32 2, %v27_v19 }
   0x5   :  { %110 = vmatprep.subr.bf16.mxu0 %v333_v4  ;;  %v339_v14 = vcombine.high %v19_v11, %v23_v12  ;;  %151 = vmatprep.subr.bf16.mxu1 %v335_v8  ;;  %v338_v17 = vcombine.low %v19_v11, %v23_v12  ;;  %v32_v23 = vsub.s32 1, %v27_v19  ;;  %v40_v24 = vsub.s32 3, %v27_v19 }
   0x6   :  { %111 = vmatpush1.bf16.msra.mxu0 %v332_v6  ;;  %152 = vmatpush1.bf16.msra.mxu1 %v334_v9  ;;  %v29_v27 = vrot.slane %v24_v21, %v28_v20  ;;  %v37_v28 = vrot.slane %v24_v21, %v36_v22  ;;  %v294_v32 = vunpack.c.0.s8 %v293_v26  ;;  %v44_v36 = vsub.s32 4, %v27_v19 }
   0x7   :  { %192 = vmatprep.subr.bf16.mxu0 %v337_v13  ;;  %233 = vmatprep.subr.bf16.mxu1 %v339_v14  ;;  %v33_v29 = vrot.slane %v24_v21, %v32_v23  ;;  %v41_v30 = vrot.slane %v24_v21, %v40_v24  ;;  %v52_v41 = vsub.s32 6, %v27_v19  ;;  %v48_v42 = vsub.s32 5, %v27_v19 }
   0x8   :  { %v56_v47 = vsub.s32 7, %v27_v19  ;;  %v297_v50 = vsub.s32 %v294_v32, %v27_v19  ;;  %v45_v53 = vrot.slane %v24_v21, %v44_v36 }
   0x9   :  { %340 = vmatmul.mubr.msk.bf16.vlgmr.msra.gmra.mrb[0].mxu0 %vm106_vm0, %v15_v15  ;;  %341 = vmatmul.mubr.msk.bf16.vlgmr.msra.gmra.mrb[0].mxu1 %vm106_vm0, %v15_v15  ;;  %v53_v55 = vrot.slane %v24_v21, %v52_v41  ;;  %v49_v56 = vrot.slane %v24_v21, %v48_v42 }
   0xa   :  { %193 = vmatpush1.bf16.msra.mxu0 %v336_v16  ;;  %234 = vmatpush1.bf16.msra.mxu1 %v338_v17  ;;  %v57_v58 = vrot.slane %v24_v21, %v56_v47 }
   0xb   :  { %224 = vmatprep.mubr.bf16.mxu0 %v346_v3  ;;  %265 = vmatprep.mubr.bf16.mxu1 %v346_v3 }
  0x11   :  { %342 = vmatmul.mubr.msk.bf16.vlgmr.msra.gmra.mrb[4].mxu0 %vm106_vm0, %v15_v15  ;;  %343 = vmatmul.mubr.msk.bf16.vlgmr.msra.gmra.mrb[4].mxu1 %vm106_vm0, %v15_v15 }
  0xdc   :  { %v144_v31 = vpop.f32.mrb[0].mxu0  ;;  %v185_v34 = vpop.f32.mrb[0].mxu1 }
  0xdd   :  { %v145_v33 = vadd.f32 %v144_v31, %v29_v27  ;;  %v146_v35 = vpop.f32.mrb[1].mxu0  ;;  %v186_v37 = vadd.f32 %v185_v34, %v37_v28  ;;  %v187_v39 = vpop.f32.mrb[1].mxu1 }
  0xde   :  { %v147_v38 = vadd.f32 %v146_v35, %v33_v29  ;;  %v148_v40 = vpop.f32.mrb[2].mxu0  ;;  %v188_v44 = vadd.f32 %v187_v39, %v41_v30  ;;  %v189_v45 = vpop.f32.mrb[2].mxu1 }
  0xdf   :  { %v274_v43 = vmax.f32 %v145_v33, 0.0  ;;  %v149_v46 = vpop.f32.mrb[3].mxu0  ;;  %v276_v48 = vmax.f32 %v186_v37, 0.0  ;;  %v190_v51 = vpop.f32.mrb[3].mxu1 }
  0xe0   :  { %v275_v49 = vmax.f32 %v147_v38, 0.0  ;;  %v277_v52 = vmax.f32 %v188_v44, 0.0 }
  0xe2   :  { %v290_v54 = vcombine.low %v274_v43, %v275_v49  ;;  %v291_v57 = vcombine.low %v276_v48, %v277_v52 }
  0xe4   :  { %v298_v59 = vrot.slane %v290_v54, %v297_v50  ;;  %v226_v60 = vpop.f32.mrb[4].mxu0  ;;  %v305_v61 = vrot.slane %v291_v57, %v297_v50  ;;  %v267_v63 = vpop.f32.mrb[4].mxu1 }
  0xe5   :  { %v227_v62 = vadd.f32 %v226_v60, %v45_v53  ;;  %v228_v0 = vpop.f32.mrb[5].mxu0  ;;  %v268_v1 = vadd.f32 %v267_v63, %v53_v55  ;;  %v269_v3 = vpop.f32.mrb[5].mxu1 }
  0xe6   :  { %v229_v2 = vadd.f32 %v228_v0, %v49_v56  ;;  %v230_v4 = vpop.f32.mrb[6].mxu0  ;;  %v306_v5 = vcombine.low %v298_v59, %v305_v61  ;;  %v270_v7 = vadd.f32 %v269_v3, %v57_v58  ;;  %v271_v8 = vpop.f32.mrb[6].mxu1 }
  0xe7   :  { %v278_v6 = vmax.f32 %v227_v62, 0.0  ;;  %v231_v9 = vpop.f32.mrb[7].mxu0  ;;  %v280_v10 = vmax.f32 %v268_v1, 0.0  ;;  %v272_v12 = vpop.f32.mrb[7].mxu1 }
  0xe8   :  { %v279_v11 = vmax.f32 %v229_v2, 0.0  ;;  %326 = vst [vmem:[%s407_s3] sm:$0xff] %v306_v5  ;;  %v281_v13 = vmax.f32 %v270_v7, 0.0 }
  0xea   :  { %v307_v14 = vcombine.low %v278_v6, %v279_v11  ;;  %v308_v15 = vcombine.low %v280_v10, %v281_v13 }
  0xec   :  { %v315_v16 = vrot.slane %v307_v14, %v297_v50  ;;  %v322_v17 = vrot.slane %v308_v15, %v297_v50 }
  0xee   :  { %v323_v18 = vcombine.low %v315_v16, %v322_v17 }
  0xf0   :  { %327 = vst [vmem:[%s407_s3 + $0x8] sm:$0xff] %v323_v18 }

// kernel: _lambda_.6
= control target key start
LH: loop header
LB: loop body
LE: loop exit
PB: predicated region body
PF: predicated region fallthrough
CT: control target
= control target key end

     0   :  { %s635_s12 = smov 0   ;;  %s693_s0 = inlined_call_operand.vmem [shape: bf16[4,32,256], index: 0, kind: input, shape index: {}]   ;;  %s694_s1 = inlined_call_operand.vmem [shape: bf16[4,256,32], index: 1, kind: input, shape index: {}]   ;;  %s695_s2 = inlined_call_operand.vmem [shape: f32[32,1], index: 2, kind: input, shape index: {}]   ;;  %s696_s3 = inlined_call_operand.vmem [shape: f32[4,32,32], index: 3, kind: output, shape index: {}]  }
   0x1 LB: > { %s493_s13 = sadd.s32 4294967295, %s612_s12   ;;  %p497_p0 = scmp.ge.s32.totalorder %s612_s12, 1  ;;  %s612_s12 = sphi %s635_s12, %s13_s12  }
   0x2   : > { %p147_p1 = scmp.lt.s32.totalorder %s612_s12, 5 }
   0x4   : > { %p148_p2 = pnand %p497_p0, %p147_p1 }
   0x5   : > { %p176_p3 = scmp.lt.s32.totalorder (!%p148_p2), %s493_s13, 3  ;;  %v230_v0 = vld [vmem:[%s695_s2 + $0x10] sm:$0xff] (!%p148_p2)  ;;  %v228_v1 = vld [vmem:[%s695_s2] sm:$0xff] (!%p148_p2)  ;;  %v614_v2 = vmov (!%p148_p2), 0   ;;  %v231_v3 = vld [vmem:[%s695_s2 + $0x18] sm:$0xff] (!%p148_p2)  ;;  %vm421_vm0 = vcmask (!%p148_p2), 261120  }
   0x6   : > { %151 = sbr.rel (%p148_p2) target bundleno = 271 (0x10f), region = 32  ;;  %583 = vset.pattern.permute.xlu1 (!%p148_p2), %v614_v2  ;;  %582 = vset.pattern.permute.xlu0 (!%p148_p2), %v614_v2  ;;  %v229_v4 = vld [vmem:[%s695_s2 + $0x8] sm:$0xff] (!%p148_p2) }
   0x7   : > { %244 = vperm.xlu1 (!%p148_p2), %583, %v230_v0   ;;  %234 = vperm.xlu0 (!%p148_p2), %582, %v228_v1  }
   0xb   : > { %249 = vperm.xlu1 (!%p148_p2), %583, %v231_v3   ;;  %239 = vperm.xlu0 (!%p148_p2), %582, %v229_v4  }
   0xd   : > { %s698_s13 = smov (!%p176_p3, %s493_s13), 3 }
   0xe   : > { %s527_s22 = sshll.u32 %s698_s13, 7  ;;  %s526_s26 = sshll.u32 %s698_s13, 5 }
   0xf   : > { %s661_s25 = scalar_lea.vmem %s694_s1, %s527_s22  ;;  %s180_s29 = scalar_lea.vmem %s693_s0, %s526_s26 }
  0x10   : > { %v584_v5 = vld [vmem:[%s661_s25 + $0x40] sm:$0xff]   ;;  %v586_v7 = vld [vmem:[%s661_s25 + $0x48] sm:$0xff]   ;;  %v588_v9 = vld [vmem:[%s661_s25 + $0x50] sm:$0xff]   ;;  %s190_s5 = scalar_lea.vmem %s696_s3, %s526_s26 }
  0x11   : > { %v585_v6 = vld [vmem:[%s661_s25] sm:$0xff]   ;;  %529 = vmatprep.subr.bf16.mxu0 %v584_v5  ;;  %557 = vmatprep.subr.bf16.mxu1 %v584_v5  ;;  %v587_v8 = vld [vmem:[%s661_s25 + $0x8] sm:$0xff]   ;;  %v589_v10 = vld [vmem:[%s661_s25 + $0x10] sm:$0xff]  }
  0x12   : > { %530 = vmatpush3.bf16.msra.mxu0 %v585_v6  ;;  %565 = vmatpush3.bf16.msra.mxu1 %v585_v6  ;;  %v590_v11 = vld [vmem:[%s661_s25 + $0x58] sm:$0xff]   ;;  %v592_v13 = vld [vmem:[%s661_s25 + $0x60] sm:$0xff]   ;;  %v594_v15 = vld [vmem:[%s661_s25 + $0x68] sm:$0xff]  }
  0x13   : > { %531 = vmatprep.subr.bf16.mxu0 %v586_v7  ;;  %558 = vmatprep.subr.bf16.mxu1 %v586_v7  ;;  %v591_v12 = vld [vmem:[%s661_s25 + $0x18] sm:$0xff]   ;;  %v593_v14 = vld [vmem:[%s661_s25 + $0x20] sm:$0xff]   ;;  %v595_v18 = vld [vmem:[%s661_s25 + $0x28] sm:$0xff]  }
  0x14   : > { %v602_v16 = vld [vmem:[%s180_s29 + $0x4] ss:$8 sps:$4 sm:$0xff]   ;;  %v605_v17 = vld [vmem:[%s180_s29 + $0x14] ss:$8 sps:$4 sm:$0xff]   ;;  %v600_v23 = vld [vmem:[%s180_s29] ss:$8 sps:$4 sm:$0xff]  }
  0x15   : > { %v596_v19 = vld [vmem:[%s661_s25 + $0x70] sm:$0xff]   ;;  %400 = vmatprep.mubr.bf16.mxu0 %v602_v16  ;;  %408 = vmatprep.mubr.bf16.mxu1 %v605_v17  ;;  %v598_v21 = vld [vmem:[%s661_s25 + $0x78] sm:$0xff]  }
  0x16   : > { %532 = vmatpush3.bf16.msra.mxu0 %v587_v8  ;;  %566 = vmatpush3.bf16.msra.mxu1 %v587_v8  ;;  %v597_v20 = vld [vmem:[%s661_s25 + $0x30] sm:$0xff]   ;;  %v599_v22 = vld [vmem:[%s661_s25 + $0x38] sm:$0xff]  }
  0x17   : > { %533 = vmatprep.subr.bf16.mxu0 %v588_v9  ;;  %559 = vmatprep.subr.bf16.mxu1 %v588_v9  ;;  %v603_v24 = vld [vmem:[%s180_s29 + $0x10] ss:$8 sps:$4 sm:$0xff]  }
  0x1a   : > { %534 = vmatpush3.bf16.msra.mxu0 %v589_v10  ;;  %567 = vmatpush3.bf16.msra.mxu1 %v589_v10 }
  0x1b   : > { %535 = vmatprep.subr.bf16.mxu0 %v590_v11  ;;  %560 = vmatprep.subr.bf16.mxu1 %v590_v11 }
  0x1e   : > { %536 = vmatpush3.bf16.msra.mxu0 %v591_v12  ;;  %568 = vmatpush3.bf16.msra.mxu1 %v591_v12 }
  0x1f   : > { %537 = vmatprep.subr.bf16.mxu0 %v592_v13  ;;  %561 = vmatprep.subr.bf16.mxu1 %v592_v13 }
  0x22   : > { %538 = vmatpush3.bf16.msra.mxu0 %v593_v14  ;;  %569 = vmatpush3.bf16.msra.mxu1 %v593_v14 }
  0x23   : > { %539 = vmatprep.subr.bf16.mxu0 %v594_v15  ;;  %562 = vmatprep.subr.bf16.mxu1 %v594_v15 }
  0x26   : > { %540 = vmatpush3.bf16.msra.mxu0 %v595_v18  ;;  %570 = vmatpush3.bf16.msra.mxu1 %v595_v18 }
  0x27   : > { %541 = vmatprep.subr.bf16.mxu0 %v596_v19  ;;  %563 = vmatprep.subr.bf16.mxu1 %v596_v19 }
  0x2a   : > { %542 = vmatpush3.bf16.msra.mxu0 %v597_v20  ;;  %571 = vmatpush3.bf16.msra.mxu1 %v597_v20 }
  0x2b   : > { %543 = vmatprep.subr.bf16.mxu0 %v598_v21  ;;  %564 = vmatprep.subr.bf16.mxu1 %v598_v21 }
  0x2e   : > { %544 = vmatpush3.bf16.msra.mxu0 %v599_v22  ;;  %572 = vmatpush3.bf16.msra.mxu1 %v599_v22 }
  0x31   : > { %401 = vmatmul.mubr.bf16.vlgmr.msra.gmra.mrb[0].mxu0 %v600_v23  ;;  %409 = vmatmul.mubr.bf16.vlgmr.msra.gmra.mrb[0].mxu1 %v603_v24 }
  0x86   : > { %v245_v25 = vpop.permute.xlu1 %244  ;;  %v235_v26 = vpop.permute.xlu0 %234 }
  0x8a   : > { %v250_v41 = vpop.permute.xlu1 %249  ;;  %v240_v42 = vpop.permute.xlu0 %239 }
 0x104   : > { %v545_v27 = vpop.f32.mrb[0].mxu0  ;;  %v551_v28 = vpop.f32.mrb[0].mxu1 }
 0x105   : > { %v546_v29 = vpop.f32.mrb[1].mxu0  ;;  %v552_v30 = vpop.f32.mrb[1].mxu1 }
 0x106   : > { %v547_v31 = vadd.f32 %v546_v29, %v545_v27  ;;  %v553_v32 = vadd.f32 %v552_v30, %v551_v28  ;;  %v548_v33 = vpop.f32.mrb[2].mxu0  ;;  %v554_v34 = vpop.f32.mrb[2].mxu1 }
 0x107   : > { %v549_v35 = vpop.f32.mrb[3].mxu0  ;;  %v555_v36 = vpop.f32.mrb[3].mxu1 }
 0x108   : > { %v403_v37 = vadd.f32 %v547_v31, %v235_v26  ;;  %v411_v38 = vadd.f32 %v553_v32, %v245_v25  ;;  %v550_v39 = vadd.f32 %v549_v35, %v548_v33  ;;  %v556_v40 = vadd.f32 %v555_v36, %v554_v34 }
 0x10a   : > { %v417_v43 = vmax.f32 %v403_v37, 0.0  ;;  %v419_v44 = vmax.f32 %v411_v38, 0.0  ;;  %v406_v45 = vadd.f32 %v550_v39, %v240_v42  ;;  %v414_v46 = vadd.f32 %v556_v40, %v250_v41 }
 0x10c   : > { %422 = vst.msk [vmem:[%s190_s5] sm:$0xff] %vm421_vm0, %v417_v43  ;;  %424 = vst.msk [vmem:[%s190_s5 + $0x10] sm:$0xff] %vm421_vm0, %v419_v44  ;;  %v418_v47 = vmax.f32 %v406_v45, 0.0  ;;  %v420_v48 = vmax.f32 %v414_v46, 0.0 }
 0x10e   : > { %423 = vst.msk [vmem:[%s190_s5 + $0x8] sm:$0xff] %vm421_vm0, %v418_v47  ;;  %425 = vst.msk [vmem:[%s190_s5 + $0x18] sm:$0xff] %vm421_vm0, %v420_v48 }
 0x10f PF: > { %s13_s12 = sadd.s32 1, %s612_s12  }
 0x110   : > { %p10_p4 = scmp.ge.s32.totalorder %s13_s12, 6  }
 0x112   :  { %12 = sbr.rel (!%p10_p4) target bundleno = 1 (0x1), region = 65 }

// kernel: _lambda_.7
= control target key start
LH: loop header
LB: loop body
LE: loop exit
PB: predicated region body
PF: predicated region fallthrough
CT: control target
= control target key end

     0   :  { %s494_s12 = smov 0   ;;  %s525_s0 = inlined_call_operand.vmem [shape: bf16[4,16,128], index: 0, kind: input, shape index: {}]   ;;  %s526_s1 = inlined_call_operand.vmem [shape: bf16[4,128,128], index: 1, kind: input, shape index: {}]   ;;  %s527_s2 = inlined_call_operand.vmem [shape: f32[16,1], index: 2, kind: input, shape index: {}]   ;;  %s528_s3 = inlined_call_operand.vmem [shape: f32[4,16,128], index: 3, kind: output, shape index: {}]  }
   0x1 LB: > { %s388_s13 = sadd.s32 4294967295, %s469_s12   ;;  %p392_p0 = scmp.ge.s32.totalorder %s469_s12, 1  ;;  %s469_s12 = sphi %s494_s12, %s13_s12  }
   0x2   : > { %p147_p1 = scmp.lt.s32.totalorder %s469_s12, 5 }
   0x4   : > { %p148_p2 = pnand %p392_p0, %p147_p1 }
   0x5   : > { %p176_p3 = scmp.lt.s32.totalorder (!%p148_p2), %s388_s13, 3  ;;  %v210_v0 = vld [vmem:[%s527_s2] sm:$0xff] (!%p148_p2)  ;;  %v471_v1 = vmov (!%p148_p2), 0.0   ;;  %vm472_vm0 = vmmov (!%p148_p2), 0   ;;  %v473_v2 = vmov (!%p148_p2), 0   ;;  %v211_v3 = vld [vmem:[%s527_s2 + $0x8] sm:$0xff] (!%p148_p2) }
   0x6   : > { %151 = sbr.rel (%p148_p2) target bundleno = 267 (0x10b), region = 32  ;;  %422 = vmatprep.subr.bf16.mxu0 (!%p148_p2), %v471_v1  ;;  %438 = vmatprep.mubr.msk.bf16.mxu0 (!%p148_p2), %vm472_vm0, %v471_v1 }
   0x7   : > { %453 = vset.pattern.permute.xlu0 (!%p148_p2), %v473_v2 }
   0x8   : > { %214 = vperm.xlu0 (!%p148_p2), %453, %v210_v0  }
   0xc   : > { %219 = vperm.xlu0 (!%p148_p2), %453, %v211_v3  }
   0xd   : > { %s530_s13 = smov (!%p176_p3, %s388_s13), 3 }
   0xe   : > { %s411_s16 = sshll.u32 %s530_s13, 6  ;;  %s410_s22 = sshll.u32 %s530_s13, 3 }
   0xf   : > { %s185_s21 = scalar_lea.vmem %s526_s1, %s411_s16  ;;  %s180_s25 = scalar_lea.vmem %s525_s0, %s410_s22 }
  0x10   : > { %v454_v4 = vld [vmem:[%s185_s21] sm:$0xff]   ;;  %v455_v5 = vld [vmem:[%s185_s21 + $0x8] sm:$0xff]   ;;  %v456_v6 = vld [vmem:[%s185_s21 + $0x10] sm:$0xff]   ;;  %s412_s26 = sshll.u32 %s530_s13, 4 }
  0x11   : > { %423 = vmatpush3.bf16.msra.mxu0 %v454_v4  ;;  %v457_v7 = vld [vmem:[%s185_s21 + $0x18] sm:$0xff]   ;;  %v458_v8 = vld [vmem:[%s185_s21 + $0x20] sm:$0xff]   ;;  %v459_v9 = vld [vmem:[%s185_s21 + $0x28] sm:$0xff]   ;;  %s190_s29 = scalar_lea.vmem %s528_s3, %s412_s26 }
  0x12   : > { %424 = vmatprep.subr.bf16.mxu0 %v471_v1  ;;  %v460_v10 = vld [vmem:[%s185_s21 + $0x30] sm:$0xff]   ;;  %v461_v11 = vld [vmem:[%s185_s21 + $0x38] sm:$0xff]   ;;  %v462_v12 = vld [vmem:[%s180_s25] sm:$0xff]  }
  0x15   : > { %425 = vmatpush3.bf16.msra.mxu0 %v455_v5 }
  0x16   : > { %426 = vmatprep.subr.bf16.mxu0 %v471_v1 }
  0x19   : > { %427 = vmatpush3.bf16.msra.mxu0 %v456_v6 }
  0x1a   : > { %428 = vmatprep.subr.bf16.mxu0 %v471_v1 }
  0x1d   : > { %429 = vmatpush3.bf16.msra.mxu0 %v457_v7 }
  0x1e   : > { %430 = vmatprep.subr.bf16.mxu0 %v471_v1 }
  0x21   : > { %431 = vmatpush3.bf16.msra.mxu0 %v458_v8 }
  0x22   : > { %432 = vmatprep.subr.bf16.mxu0 %v471_v1 }
  0x25   : > { %433 = vmatpush3.bf16.msra.mxu0 %v459_v9 }
  0x26   : > { %434 = vmatprep.subr.bf16.mxu0 %v471_v1 }
  0x29   : > { %435 = vmatpush3.bf16.msra.mxu0 %v460_v10 }
  0x2a   : > { %436 = vmatprep.subr.bf16.mxu0 %v471_v1 }
  0x2d   : > { %437 = vmatpush3.bf16.msra.mxu0 %v461_v11 }
  0x30   : > { %439 = vmatmul.mubr.bf16.vlgmr.msra.gmra.mrb[0].mxu0 %v462_v12 }
  0x87   : > { %v215_v13 = vpop.permute.xlu0 %214 }
  0x8b   : > { %v220_v17 = vpop.permute.xlu0 %219 }
 0x103   : > { %v310_v14 = vpop.f32.mrb[0].mxu0 }
 0x104   : > { %v311_v15 = vadd.f32 %v310_v14, %v215_v13  ;;  %v440_v16 = vpop.f32.mrb[1].mxu0 }
 0x105   : > { %v313_v18 = vpop.f32.mrb[2].mxu0 }
 0x106   : > { %v317_v19 = vmax.f32 %v311_v15, 0.0  ;;  %v314_v20 = vadd.f32 %v313_v18, %v220_v17  ;;  %v441_v21 = vpop.f32.mrb[3].mxu0 }
 0x108   : > { %319 = vst [vmem:[%s190_s29] sm:$0xff] %v317_v19  ;;  %v318_v22 = vmax.f32 %v314_v20, 0.0 }
 0x10a   : > { %320 = vst [vmem:[%s190_s29 + $0x8] sm:$0xff] %v318_v22 }
 0x10b PF: > { %s13_s12 = sadd.s32 1, %s469_s12  }
 0x10c   : > { %p10_p4 = scmp.ge.s32.totalorder %s13_s12, 6  }
 0x10e   :  { %12 = sbr.rel (!%p10_p4) target bundleno = 1 (0x1), region = 65 }

// kernel: _lambda_.8
= control target key start
LH: loop header
LB: loop body
LE: loop exit
PB: predicated region body
PF: predicated region fallthrough
CT: control target
= control target key end

     0   :  { %s548_s12 = smov 0   ;;  %s576_s0 = inlined_call_operand.vmem [shape: bf16[4,8,64], index: 0, kind: input, shape index: {}]   ;;  %s577_s1 = inlined_call_operand.vmem [shape: bf16[4,64,512], index: 1, kind: input, shape index: {}]   ;;  %s578_s2 = inlined_call_operand.vmem [shape: f32[8,1], index: 2, kind: input, shape index: {}]   ;;  %s579_s3 = inlined_call_operand.vmem [shape: f32[4,8,512], index: 3, kind: output, shape index: {}]  }
   0x1 LB: > { %s453_s13 = sadd.s32 4294967295, %s525_s12   ;;  %p457_p0 = scmp.ge.s32.totalorder %s525_s12, 1  ;;  %s525_s12 = sphi %s548_s12, %s13_s12  }
   0x2   : > { %p146_p1 = scmp.lt.s32.totalorder %s525_s12, 5 }
   0x4   : > { %p147_p2 = pnand %p457_p0, %p146_p1 }
   0x5   : > { %p174_p3 = scmp.lt.s32.totalorder (!%p147_p2), %s453_s13, 3  ;;  %v206_v0 = vld [vmem:[%s578_s2] sm:$0xff] (!%p147_p2)  ;;  %v527_v1 = vmov (!%p147_p2), 0   ;;  %vm292_vm0 = vcmask (!%p147_p2), 523264  }
   0x6   : > { %150 = sbr.rel (%p147_p2) target bundleno = 251 (0xfb), region = 32  ;;  %328 = vmatprep.mubr.bf16.mxu0 (!%p147_p2), %v527_v1  ;;  %369 = vmatprep.mubr.bf16.mxu1 (!%p147_p2), %v527_v1 }
   0x7   : > { %494 = vset.pattern.permute.xlu0 (!%p147_p2), %v527_v1 }
   0x8   : > { %209 = vperm.xlu0 (!%p147_p2), %494, %v206_v0  }
   0xd   : > { %s581_s13 = smov (!%p174_p3, %s453_s13), 3 }
   0xe   : > { %s483_s16 = sshll.u32 %s581_s13, 7  ;;  %s458_s20 = sshll.u32 %s581_s13, 2 }
   0xf   : > { %s182_s19 = scalar_lea.vmem %s577_s1, %s483_s16  ;;  %s177_s23 = scalar_lea.vmem %s576_s0, %s458_s20 }
  0x10   : > { %v495_v2 = vld [vmem:[%s182_s19 + $0x4] ss:$16 sps:$4 sm:$0xff]   ;;  %v497_v3 = vld [vmem:[%s182_s19 + $0xc] ss:$16 sps:$4 sm:$0xff]   ;;  %v499_v4 = vld [vmem:[%s182_s19] ss:$16 sps:$4 sm:$0xff]  }
  0x11   : > { %296 = vmatprep.subr.bf16.mxu0 %v495_v2  ;;  %v500_v5 = vld [vmem:[%s182_s19 + $0x8] ss:$16 sps:$4 sm:$0xff]   ;;  %337 = vmatprep.subr.bf16.mxu1 %v497_v3  ;;  %v501_v6 = vld [vmem:[%s182_s19 + $0x24] ss:$16 sps:$4 sm:$0xff]   ;;  %v503_v7 = vld [vmem:[%s182_s19 + $0x2c] ss:$16 sps:$4 sm:$0xff]  }
  0x12   : > { %297 = vmatpush1.bf16.msra.mxu0 %v499_v4  ;;  %338 = vmatpush1.bf16.msra.mxu1 %v500_v5  ;;  %v505_v8 = vld [vmem:[%s182_s19 + $0x20] ss:$16 sps:$4 sm:$0xff]   ;;  %v506_v9 = vld [vmem:[%s182_s19 + $0x28] ss:$16 sps:$4 sm:$0xff]   ;;  %v507_v10 = vld [vmem:[%s182_s19 + $0x44] ss:$16 sps:$4 sm:$0xff]  }
  0x13   : > { %298 = vmatprep.subr.bf16.mxu0 %v501_v6  ;;  %339 = vmatprep.subr.bf16.mxu1 %v503_v7  ;;  %v509_v11 = vld [vmem:[%s182_s19 + $0x4c] ss:$16 sps:$4 sm:$0xff]   ;;  %v511_v12 = vld [vmem:[%s182_s19 + $0x40] ss:$16 sps:$4 sm:$0xff]   ;;  %v512_v13 = vld [vmem:[%s182_s19 + $0x48] ss:$16 sps:$4 sm:$0xff]  }
  0x14   : > { %v513_v14 = vld [vmem:[%s182_s19 + $0x64] ss:$16 sps:$4 sm:$0xff]   ;;  %v515_v15 = vld [vmem:[%s182_s19 + $0x6c] ss:$16 sps:$4 sm:$0xff]   ;;  %v517_v16 = vld [vmem:[%s182_s19 + $0x60] ss:$16 sps:$4 sm:$0xff]  }
  0x15   : > { %v518_v17 = vld [vmem:[%s182_s19 + $0x68] ss:$16 sps:$4 sm:$0xff]   ;;  %v189_v18 = vld [vmem:[%s177_s23] sm:$0xf]  ;;  %s484_s24 = sshll.u32 %s581_s13, 5 }
  0x16   : > { %299 = vmatpush1.bf16.msra.mxu0 %v505_v8  ;;  %340 = vmatpush1.bf16.msra.mxu1 %v506_v9  ;;  %s187_s27 = scalar_lea.vmem %s579_s3, %s484_s24 }
  0x17   : > { %300 = vmatprep.subr.bf16.mxu0 %v507_v10  ;;  %341 = vmatprep.subr.bf16.mxu1 %v509_v11 }
  0x1a   : > { %301 = vmatpush1.bf16.msra.mxu0 %v511_v12  ;;  %342 = vmatpush1.bf16.msra.mxu1 %v512_v13 }
  0x1b   : > { %302 = vmatprep.subr.bf16.mxu0 %v513_v14  ;;  %343 = vmatprep.subr.bf16.mxu1 %v515_v15 }
  0x1e   : > { %303 = vmatpush1.bf16.msra.mxu0 %v517_v16  ;;  %344 = vmatpush1.bf16.msra.mxu1 %v518_v17 }
  0x21   : > { %479 = vmatmul.mubr.msk.bf16.vlgmr.msra.gmra.mrb[0].mxu0 %vm292_vm0, %v189_v18  ;;  %480 = vmatmul.mubr.msk.bf16.vlgmr.msra.gmra.mrb[0].mxu1 %vm292_vm0, %v189_v18 }
  0x87   : > { %v210_v19 = vpop.permute.xlu0 %209 }
  0xf4   : > { %v330_v20 = vpop.f32.mrb[0].mxu0  ;;  %v371_v21 = vpop.f32.mrb[0].mxu1 }
  0xf5   : > { %v331_v22 = vadd.f32 %v330_v20, %v210_v19  ;;  %v372_v23 = vadd.f32 %v371_v21, %v210_v19  ;;  %v332_v24 = vpop.f32.mrb[1].mxu0  ;;  %v373_v25 = vpop.f32.mrb[1].mxu1 }
  0xf6   : > { %v333_v26 = vadd.f32 %v332_v24, %v210_v19  ;;  %v374_v27 = vadd.f32 %v373_v25, %v210_v19  ;;  %v334_v28 = vpop.f32.mrb[2].mxu0  ;;  %v375_v29 = vpop.f32.mrb[2].mxu1 }
  0xf7   : > { %v378_v30 = vmax.f32 %v331_v22, 0.0  ;;  %v380_v31 = vmax.f32 %v372_v23, 0.0  ;;  %v335_v32 = vpop.f32.mrb[3].mxu0  ;;  %v376_v33 = vpop.f32.mrb[3].mxu1 }
  0xf8   : > { %v379_v34 = vmax.f32 %v333_v26, 0.0  ;;  %v381_v35 = vmax.f32 %v374_v27, 0.0 }
  0xf9   : > { %382 = vst [vmem:[%s187_s27] sm:$0xff] %v378_v30  ;;  %384 = vst [vmem:[%s187_s27 + $0x10] sm:$0xff] %v380_v31 }
  0xfa   : > { %383 = vst [vmem:[%s187_s27 + $0x8] sm:$0xff] %v379_v34  ;;  %385 = vst [vmem:[%s187_s27 + $0x18] sm:$0xff] %v381_v35 }
  0xfb PF: > { %s13_s12 = sadd.s32 1, %s525_s12  }
  0xfc   : > { %p10_p4 = scmp.ge.s32.totalorder %s13_s12, 6  }
  0xfe   :  { %12 = sbr.rel (!%p10_p4) target bundleno = 1 (0x1), region = 65 }

// kernel: _lambda_.9
= control target key start
LH: loop header
LB: loop body
LE: loop exit
PB: predicated region body
PF: predicated region fallthrough
CT: control target
= control target key end

     0   :  { %s1044_s14 = smov 0   ;;  %s1162_s0 = inlined_call_operand.vmem [shape: bf16[4,1,32], index: 0, kind: input, shape index: {}]   ;;  %s1163_s1 = inlined_call_operand.vmem [shape: bf16[4,32,2048], index: 1, kind: input, shape index: {}]   ;;  %s1164_s2 = inlined_call_operand.<no memory space> [shape: f32[1,1], index: 2, kind: input, shape index: {}]   ;;  %s1165_s3 = inlined_call_operand.vmem [shape: f32[4,1,2048], index: 3, kind: output, shape index: {}]  }
   0x1   :  { %v8_v0 = vstv %s1164_s2 }
   0x2   :  { %9 = vst [vmem:[#allocation2] sm:$0x1] %v8_v0 }
   0x3 LB: > { %s917_s15 = sadd.s32 4294967295, %s1017_s14   ;;  %p921_p0 = scmp.ge.s32.totalorder %s1017_s14, 1  ;;  %s1017_s14 = sphi %s1044_s14, %s15_s14  }
   0x4   : > { %p147_p1 = scmp.lt.s32.totalorder %s1017_s14, 5 }
   0x6   : > { %p148_p2 = pnand %p921_p0, %p147_p1 }
   0x7   : > { %p173_p3 = scmp.lt.s32.totalorder (!%p148_p2), %s917_s15, 3  ;;  %v1019_v2 = vmov (!%p148_p2), 0   ;;  %vm389_vm0 = vcmask (!%p148_p2), 261120  }
   0x8   : > { %151 = sbr.rel (%p148_p2) target bundleno = 293 (0x125), region = 32  ;;  %425 = vmatprep.mubr.bf16.mxu0 (!%p148_p2), %v1019_v2  ;;  %466 = vmatprep.mubr.bf16.mxu1 (!%p148_p2), %v1019_v2 }
   0x9   : > { %v219_v1 = vld [vmem:[#allocation2] sm:$0x1] (!%p148_p2)  ;;  %978 = vset.pattern.permute.xlu0 (!%p148_p2), %v1019_v2 }
   0xa   : > { %222 = vperm.xlu0 (!%p148_p2), %978, %v219_v1  }
   0xf   : > { %s1167_s15 = smov (!%p173_p3, %s917_s15), 3 }
  0x10   : > { %s967_s2 = sshll.u32 %s1167_s15, 8  ;;  %s175_s21 = scalar_lea.vmem %s1162_s0, %s1167_s15 }
  0x11   : > { %s1061_s18 = scalar_lea.vmem %s1163_s1, %s967_s2  ;;  %v1083_v29 = vld [vmem:[%s175_s21] sm:$0x1]  ;;  %s924_s22 = sshll.u32 %s1167_s15, 4 }
  0x12   : > { %v187_v3 = vld [vmem:[%s1061_s18] sm:$0xff]  ;;  %v188_v5 = vld [vmem:[%s1061_s18 + $0x8] sm:$0xff]  ;;  %v189_v16 = vld [vmem:[%s1061_s18 + $0x10] sm:$0xff]  ;;  %s184_s25 = scalar_lea.vmem %s1165_s3, %s924_s22 }
  0x13   : > { %v195_v4 = vld [vmem:[%s1061_s18 + $0x40] sm:$0xff]  ;;  %v196_v7 = vld [vmem:[%s1061_s18 + $0x48] sm:$0xff]  ;;  %v197_v18 = vld [vmem:[%s1061_s18 + $0x50] sm:$0xff] }
  0x14   : > { %v926_v6 = vcombine.high %v187_v3, %v195_v4  ;;  %v925_v8 = vcombine.low %v187_v3, %v195_v4  ;;  %v203_v9 = vld [vmem:[%s1061_s18 + $0x80] sm:$0xff]  ;;  %v928_v11 = vcombine.high %v188_v5, %v196_v7  ;;  %v927_v12 = vcombine.low %v188_v5, %v196_v7  ;;  %v204_v14 = vld [vmem:[%s1061_s18 + $0x88] sm:$0xff]  ;;  %v190_v19 = vld [vmem:[%s1061_s18 + $0x18] sm:$0xff] }
  0x15   : > { %v211_v10 = vld [vmem:[%s1061_s18 + $0xc0] sm:$0xff]  ;;  %v212_v15 = vld [vmem:[%s1061_s18 + $0xc8] sm:$0xff]  ;;  %v198_v20 = vld [vmem:[%s1061_s18 + $0x58] sm:$0xff]  ;;  %v930_v23 = vcombine.high %v189_v16, %v197_v18  ;;  %v929_v30 = vcombine.low %v189_v16, %v197_v18  ;;  %v225_v5 = vlaneseq }
  0x16   : > { %v942_v13 = vcombine.high %v203_v9, %v211_v10  ;;  %393 = vmatprep.subr.bf16.mxu0 %v926_v6  ;;  %v944_v17 = vcombine.high %v204_v14, %v212_v15  ;;  %434 = vmatprep.subr.bf16.mxu1 %v928_v11  ;;  %v941_v21 = vcombine.low %v203_v9, %v211_v10  ;;  %v205_v25 = vld [vmem:[%s1061_s18 + $0x90] sm:$0xff]  ;;  %v206_v27 = vld [vmem:[%s1061_s18 + $0x98] sm:$0xff]  ;;  %v191_v34 = vld [vmem:[%s1061_s18 + $0x20] sm:$0xff] }
  0x17   : > { %394 = vmatpush1.bf16.msra.mxu0 %v925_v8  ;;  %435 = vmatpush1.bf16.msra.mxu1 %v927_v12  ;;  %v943_v22 = vcombine.low %v204_v14, %v212_v15  ;;  %v932_v24 = vcombine.high %v190_v19, %v198_v20  ;;  %v213_v26 = vld [vmem:[%s1061_s18 + $0xd0] sm:$0xff]  ;;  %v214_v28 = vld [vmem:[%s1061_s18 + $0xd8] sm:$0xff]  ;;  %v931_v31 = vcombine.low %v190_v19, %v198_v20  ;;  %v199_v35 = vld [vmem:[%s1061_s18 + $0x60] sm:$0xff]  ;;  %v226_v6 = vshrl.u32 %v225_v5, 7 }
  0x18   : > { %395 = vmatprep.subr.bf16.mxu0 %v942_v13  ;;  %436 = vmatprep.subr.bf16.mxu1 %v944_v17  ;;  %v946_v32 = vcombine.high %v205_v25, %v213_v26  ;;  %v948_v33 = vcombine.high %v206_v27, %v214_v28  ;;  %v192_v36 = vld [vmem:[%s1061_s18 + $0x28] sm:$0xff]  ;;  %v945_v38 = vcombine.low %v205_v25, %v213_v26  ;;  %v207_v42 = vld [vmem:[%s1061_s18 + $0xa0] sm:$0xff]  ;;  %v193_v50 = vld [vmem:[%s1061_s18 + $0x30] sm:$0xff] }
  0x19   : > { %v200_v37 = vld [vmem:[%s1061_s18 + $0x68] sm:$0xff]  ;;  %v947_v39 = vcombine.low %v206_v27, %v214_v28  ;;  %v934_v40 = vcombine.high %v191_v34, %v199_v35  ;;  %v215_v43 = vld [vmem:[%s1061_s18 + $0xe0] sm:$0xff]  ;;  %v933_v46 = vcombine.low %v191_v34, %v199_v35  ;;  %v201_v51 = vld [vmem:[%s1061_s18 + $0x70] sm:$0xff]  ;;  %v227_v7 = vsub.s32 0, %v226_v6 }
  0x1a   : > { %v936_v41 = vcombine.high %v192_v36, %v200_v37  ;;  %v208_v44 = vld [vmem:[%s1061_s18 + $0xa8] sm:$0xff]  ;;  %v935_v47 = vcombine.low %v192_v36, %v200_v37  ;;  %v950_v48 = vcombine.high %v207_v42, %v215_v43  ;;  %v194_v52 = vld [vmem:[%s1061_s18 + $0x38] sm:$0xff]  ;;  %v949_v54 = vcombine.low %v207_v42, %v215_v43  ;;  %v209_v58 = vld [vmem:[%s1061_s18 + $0xb0] sm:$0xff] }
  0x1b   : > { %396 = vmatpush1.bf16.msra.mxu0 %v941_v21  ;;  %437 = vmatpush1.bf16.msra.mxu1 %v943_v22  ;;  %v216_v45 = vld [vmem:[%s1061_s18 + $0xe8] sm:$0xff]  ;;  %v202_v53 = vld [vmem:[%s1061_s18 + $0x78] sm:$0xff]  ;;  %v938_v56 = vcombine.high %v193_v50, %v201_v51  ;;  %v217_v59 = vld [vmem:[%s1061_s18 + $0xf0] sm:$0xff]  ;;  %v937_v62 = vcombine.low %v193_v50, %v201_v51  ;;  %v1020_v21 = vmov 1966171168  }
  0x1c   : > { %475 = vmatprep.subr.bf16.mxu0 %v930_v23  ;;  %516 = vmatprep.subr.bf16.mxu1 %v932_v24  ;;  %v952_v49 = vcombine.high %v208_v44, %v216_v45  ;;  %v951_v55 = vcombine.low %v208_v44, %v216_v45  ;;  %v940_v57 = vcombine.high %v194_v52, %v202_v53  ;;  %v210_v60 = vld [vmem:[%s1061_s18 + $0xb8] sm:$0xff]  ;;  %v758_v22 = vunpack.c.l.s4 %v1020_v21 }
  0x1d   : > { %v218_v61 = vld [vmem:[%s1061_s18 + $0xf8] sm:$0xff]  ;;  %v939_v63 = vcombine.low %v194_v52, %v202_v53  ;;  %v954_v0 = vcombine.high %v209_v58, %v217_v59  ;;  %v953_v3 = vcombine.low %v209_v58, %v217_v59 }
  0x1e   : > { %957 = vmatmul.mubr.msk.bf16.vlgmr.msra.gmra.mrb[0].mxu0 %vm389_vm0, %v1083_v29  ;;  %958 = vmatmul.mubr.msk.bf16.vlgmr.msra.gmra.mrb[0].mxu1 %vm389_vm0, %v1083_v29  ;;  %v956_v1 = vcombine.high %v210_v60, %v218_v61  ;;  %v955_v4 = vcombine.low %v210_v60, %v218_v61  ;;  %v759_v27 = vunpack.c.0.s8 %v758_v22 }
  0x1f   : > { %476 = vmatpush1.bf16.msra.mxu0 %v929_v30  ;;  %517 = vmatpush1.bf16.msra.mxu1 %v931_v31 }
  0x20   : > { %477 = vmatprep.subr.bf16.mxu0 %v946_v32  ;;  %518 = vmatprep.subr.bf16.mxu1 %v948_v33 }
  0x21   : > { %507 = vmatprep.mubr.bf16.mxu0 %v1019_v2  ;;  %548 = vmatprep.mubr.bf16.mxu1 %v1019_v2 }
  0x23   : > { %478 = vmatpush1.bf16.msra.mxu0 %v945_v38  ;;  %519 = vmatpush1.bf16.msra.mxu1 %v947_v39  ;;  %v1133_v38 = vsub.s32 %v759_v27, %v226_v6 }
  0x24   : > { %557 = vmatprep.subr.bf16.mxu0 %v934_v40  ;;  %598 = vmatprep.subr.bf16.mxu1 %v936_v41 }
  0x26   : > { %959 = vmatmul.mubr.msk.bf16.vlgmr.msra.gmra.mrb[4].mxu0 %vm389_vm0, %v1083_v29  ;;  %960 = vmatmul.mubr.msk.bf16.vlgmr.msra.gmra.mrb[4].mxu1 %vm389_vm0, %v1083_v29 }
  0x27   : > { %558 = vmatpush1.bf16.msra.mxu0 %v933_v46  ;;  %599 = vmatpush1.bf16.msra.mxu1 %v935_v47 }
  0x28   : > { %559 = vmatprep.subr.bf16.mxu0 %v950_v48  ;;  %600 = vmatprep.subr.bf16.mxu1 %v952_v49 }
  0x29   : > { %589 = vmatprep.mubr.bf16.mxu0 %v1019_v2  ;;  %630 = vmatprep.mubr.bf16.mxu1 %v1019_v2 }
  0x2b   : > { %560 = vmatpush1.bf16.msra.mxu0 %v949_v54  ;;  %601 = vmatpush1.bf16.msra.mxu1 %v951_v55 }
  0x2c   : > { %639 = vmatprep.subr.bf16.mxu0 %v938_v56  ;;  %680 = vmatprep.subr.bf16.mxu1 %v940_v57 }
  0x2e   : > { %961 = vmatmul.mubr.msk.bf16.vlgmr.msra.gmra.mrb[8].mxu0 %vm389_vm0, %v1083_v29  ;;  %962 = vmatmul.mubr.msk.bf16.vlgmr.msra.gmra.mrb[8].mxu1 %vm389_vm0, %v1083_v29 }
  0x2f   : > { %640 = vmatpush1.bf16.msra.mxu0 %v937_v62  ;;  %681 = vmatpush1.bf16.msra.mxu1 %v939_v63 }
  0x30   : > { %641 = vmatprep.subr.bf16.mxu0 %v954_v0  ;;  %682 = vmatprep.subr.bf16.mxu1 %v956_v1 }
  0x31   : > { %671 = vmatprep.mubr.bf16.mxu0 %v1019_v2  ;;  %712 = vmatprep.mubr.bf16.mxu1 %v1019_v2 }
  0x33   : > { %642 = vmatpush1.bf16.msra.mxu0 %v953_v3  ;;  %683 = vmatpush1.bf16.msra.mxu1 %v955_v4 }
  0x36   : > { %963 = vmatmul.mubr.msk.bf16.vlgmr.msra.gmra.mrb[12].mxu0 %vm389_vm0, %v1083_v29  ;;  %964 = vmatmul.mubr.msk.bf16.vlgmr.msra.gmra.mrb[12].mxu1 %vm389_vm0, %v1083_v29 }
  0x89   : > { %v223_v8 = vpop.permute.xlu0 %222 }
  0x8a   : > { %v1123_v9 = vrot.slane %v223_v8, %v227_v7 }
  0xf1   : > { %v427_v10 = vpop.f32.mrb[0].mxu0  ;;  %v468_v12 = vpop.f32.mrb[0].mxu1 }
  0xf2   : > { %v428_v11 = vadd.f32 %v427_v10, %v1123_v9  ;;  %v429_v13 = vpop.f32.mrb[1].mxu0  ;;  %v469_v2 = vadd.f32 %v468_v12, %v1123_v9  ;;  %v470_v15 = vpop.f32.mrb[1].mxu1 }
  0xf3   : > { %v430_v14 = vadd.f32 %v429_v13, %v1123_v9  ;;  %v431_v16 = vpop.f32.mrb[2].mxu0  ;;  %v471_v17 = vadd.f32 %v470_v15, %v1123_v9  ;;  %v472_v18 = vpop.f32.mrb[2].mxu1 }
  0xf4   : > { %979 = vtanh.f32 %v428_v11  ;;  %v432_v19 = vpop.f32.mrb[3].mxu0  ;;  %v473_v20 = vpop.f32.mrb[3].mxu1 }
  0xf5   : > { %981 = vtanh.f32 %v469_v2 }
  0xf6   : > { %983 = vtanh.f32 %v430_v14 }
  0xf7   : > { %985 = vtanh.f32 %v471_v17 }
  0xf9   : > { %v509_v23 = vpop.f32.mrb[4].mxu0  ;;  %v550_v25 = vpop.f32.mrb[4].mxu1 }
  0xfa   : > { %v510_v24 = vadd.f32 %v509_v23, %v1123_v9  ;;  %v511_v26 = vpop.f32.mrb[5].mxu0  ;;  %v551_v28 = vadd.f32 %v550_v25, %v1123_v9  ;;  %v552_v30 = vpop.f32.mrb[5].mxu1 }
  0xfb   : > { %v512_v29 = vadd.f32 %v511_v26, %v1123_v9  ;;  %v513_v31 = vpop.f32.mrb[6].mxu0  ;;  %v553_v32 = vadd.f32 %v552_v30, %v1123_v9  ;;  %v554_v33 = vpop.f32.mrb[6].mxu1 }
  0xfc   : > { %987 = vtanh.f32 %v510_v24  ;;  %v514_v34 = vpop.f32.mrb[7].mxu0  ;;  %v555_v35 = vpop.f32.mrb[7].mxu1 }
  0xfd   : > { %989 = vtanh.f32 %v551_v28 }
  0xfe   : > { %v980_v36 = vpop.eup %979  ;;  %991 = vtanh.f32 %v512_v29 }
  0xff   : > { %v982_v37 = vpop.eup %981  ;;  %993 = vtanh.f32 %v553_v32 }
 0x100   : > { %v984_v39 = vpop.eup %983 }
 0x101   : > { %v986_v40 = vpop.eup %985  ;;  %v753_v41 = vcombine.low %v980_v36, %v984_v39  ;;  %v591_v42 = vpop.f32.mrb[8].mxu0 }
 0x102   : > { %v754_v43 = vcombine.low %v982_v37, %v986_v40  ;;  %v592_v44 = vadd.f32 %v591_v42, %v1123_v9  ;;  %v632_v45 = vpop.f32.mrb[8].mxu1  ;;  %v593_v46 = vpop.f32.mrb[9].mxu0 }
 0x103   : > { %v763_v47 = vrot.slane %v753_v41, %v1133_v38  ;;  %v633_v48 = vadd.f32 %v632_v45, %v1123_v9  ;;  %v594_v49 = vadd.f32 %v593_v46, %v1123_v9  ;;  %v634_v50 = vpop.f32.mrb[9].mxu1  ;;  %v595_v51 = vpop.f32.mrb[10].mxu0 }
 0x104   : > { %v770_v52 = vrot.slane %v754_v43, %v1133_v38  ;;  %995 = vtanh.f32 %v592_v44  ;;  %v635_v53 = vadd.f32 %v634_v50, %v1123_v9  ;;  %v636_v54 = vpop.f32.mrb[10].mxu1  ;;  %v596_v55 = vpop.f32.mrb[11].mxu0 }
 0x105   : > { %997 = vtanh.f32 %v633_v48  ;;  %v637_v56 = vpop.f32.mrb[11].mxu1 }
 0x106   : > { %v988_v57 = vpop.eup %987  ;;  %v785_v58 = vcombine.low %v763_v47, %v770_v52  ;;  %999 = vtanh.f32 %v594_v49 }
 0x107   : > { %v990_v59 = vpop.eup %989  ;;  %1001 = vtanh.f32 %v635_v53 }
 0x108   : > { %v992_v60 = vpop.eup %991  ;;  %v793_v19 = vrot.slane %v785_v58, %v1133_v38 }
 0x109   : > { %v994_v61 = vpop.eup %993  ;;  %v755_v62 = vcombine.low %v988_v57, %v992_v60  ;;  %v673_v63 = vpop.f32.mrb[12].mxu0 }
 0x10a   : > { %v756_v0 = vcombine.low %v990_v59, %v994_v61  ;;  %v674_v1 = vadd.f32 %v673_v63, %v1123_v9  ;;  %v714_v3 = vpop.f32.mrb[12].mxu1  ;;  %v675_v4 = vpop.f32.mrb[13].mxu0 }
 0x10b   : > { %v777_v5 = vrot.slane %v755_v62, %v1133_v38  ;;  %v715_v6 = vadd.f32 %v714_v3, %v1123_v9  ;;  %v676_v7 = vadd.f32 %v675_v4, %v1123_v9  ;;  %v716_v8 = vpop.f32.mrb[13].mxu1  ;;  %v677_v10 = vpop.f32.mrb[14].mxu0 }
 0x10c   : > { %v784_v11 = vrot.slane %v756_v0, %v1133_v38  ;;  %1003 = vtanh.f32 %v674_v1  ;;  %v717_v12 = vadd.f32 %v716_v8, %v1123_v9  ;;  %v718_v13 = vpop.f32.mrb[14].mxu1  ;;  %v678_v2 = vpop.f32.mrb[15].mxu0 }
 0x10d   : > { %1005 = vtanh.f32 %v715_v6  ;;  %v719_v14 = vpop.f32.mrb[15].mxu1 }
 0x10e   : > { %v996_v15 = vpop.eup %995  ;;  %v786_v16 = vcombine.low %v777_v5, %v784_v11  ;;  %1007 = vtanh.f32 %v676_v7 }
 0x10f   : > { %v998_v17 = vpop.eup %997  ;;  %1009 = vtanh.f32 %v717_v12 }
 0x110   : > { %v1000_v18 = vpop.eup %999  ;;  %v800_v20 = vrot.slane %v786_v16, %v1133_v38 }
 0x111   : > { %v1002_v21 = vpop.eup %1001  ;;  %v802_v9 = vcombine.low %v996_v15, %v1000_v18 }
 0x112   : > { %v801_v22 = vcombine.low %v793_v19, %v800_v20  ;;  %v803_v23 = vcombine.low %v998_v17, %v1002_v21 }
 0x113   : > { %v812_v24 = vrot.slane %v802_v9, %v1133_v38 }
 0x114   : > { %853 = vst [vmem:[%s184_s25] sm:$0xff] %v801_v22  ;;  %v819_v25 = vrot.slane %v803_v23, %v1133_v38 }
 0x116   : > { %v1004_v26 = vpop.eup %1003  ;;  %v834_v27 = vcombine.low %v812_v24, %v819_v25 }
 0x117   : > { %v1006_v28 = vpop.eup %1005 }
 0x118   : > { %v1008_v29 = vpop.eup %1007  ;;  %v842_v36 = vrot.slane %v834_v27, %v1133_v38 }
 0x119   : > { %v1010_v30 = vpop.eup %1009  ;;  %v804_v31 = vcombine.low %v1004_v26, %v1008_v29 }
 0x11a   : > { %v805_v32 = vcombine.low %v1006_v28, %v1010_v30 }
 0x11b   : > { %v826_v33 = vrot.slane %v804_v31, %v1133_v38 }
 0x11c   : > { %v833_v34 = vrot.slane %v805_v32, %v1133_v38 }
 0x11e   : > { %v835_v35 = vcombine.low %v826_v33, %v833_v34 }
 0x120   : > { %v849_v37 = vrot.slane %v835_v35, %v1133_v38 }
 0x122   : > { %v850_v39 = vcombine.low %v842_v36, %v849_v37 }
 0x124   : > { %854 = vst [vmem:[%s184_s25 + $0x8] sm:$0xff] %v850_v39 }
 0x125 PF: > { %s15_s14 = sadd.s32 1, %s1017_s14  }
 0x126   : > { %p12_p4 = scmp.ge.s32.totalorder %s15_s14, 6  }
 0x128   :  { %14 = sbr.rel (!%p12_p4) target bundleno = 3 (0x3), region = 65 }

</bundles_post_ra>
